<compile_context>
chip_gen: v7x
topology: tpu7x:2x2x1
jax: 0.10.0
libtpu: 0.0.40
codegen_flags: <defaults>
</compile_context>

<pallas_src>
import jax
import jax.numpy as jnp
from jax.experimental import pallas as pl
from jax.experimental.pallas import tpu as pltpu

_TARGET_BLOCK_BYTES = 4 << 20            # ~4 MiB per VMEM buffer, any dtype
_VMEM_LIMIT_BYTES = 48 << 20             # < physical VMEM on v5e/v6e/v7x
_LANE_CANDIDATES = (2048, 1024, 512, 256, 128)


def _affine_kernel(sb_ref, x_ref, o_ref):
    # out = x * scale + bias, computed in f32, stored in the output dtype.
    x = x_ref[...].astype(jnp.float32)
    o_ref[...] = (x * sb_ref[0] + sb_ref[1]).astype(o_ref.dtype)


def _plan_view(shape, n):
    """Pick a (rows, lane_w) 2D view of the flat tensor with no padding."""
    for lane_w in _LANE_CANDIDATES:
        if n % lane_w == 0:
            return n // lane_w, lane_w
    # Unaligned total size: keep the tensor's own trailing dim as the lane
    # axis (block last dim == full array dim satisfies the (8,128) rule).
    # Lane-sparse stores for odd sizes, but zero extra HBM passes.
    last = shape[-1] if len(shape) else 1
    return n // last, last


def _plan_block_rows(rows, lane_w, itemsize):
    """Dtype- and size-aware block rows (multiple of 32, or == rows)."""
    if rows < 32:
        return rows
    # ~_TARGET_BLOCK_BYTES per buffer ...
    by_bytes = max(32, (_TARGET_BLOCK_BYTES // (lane_w * itemsize)) // 32 * 32)
    # ... but keep >=4 grid steps so both v7x TensorCores + the DMA pipeline
    # stay busy on mid-size tensors.
    by_steps = ((pl.cdiv(rows, 4) + 31) // 32) * 32
    # TODO(synk): a huge non-128-multiple trailing dim (unaligned fallback)
    # could exceed the VMEM budget here; typical embedding shapes never do.
    return max(32, min(by_bytes, by_steps))


def _run_affine(x, scale, bias):
    """out = x * scale + bias, streamed through a lane-dense 2D view."""
    orig_shape = x.shape
    n = x.size
    out_dtype = x.dtype if jnp.issubdtype(x.dtype, jnp.floating) else jnp.float32
    if n == 0:
        return jnp.zeros(orig_shape, out_dtype)

    rows, lane_w = _plan_view(orig_shape, n)
    x2d = x.reshape(rows, lane_w)            # metadata-only by construction

    itemsize = jnp.dtype(x.dtype).itemsize
    block_rows = _plan_block_rows(rows, lane_w, itemsize)
    grid = (pl.cdiv(rows, block_rows),)

    sb = jnp.stack([jnp.asarray(scale, jnp.float32),
                    jnp.asarray(bias, jnp.float32)])

    cost = pl.CostEstimate(
        flops=2 * n,
        transcendentals=0,
        bytes_accessed=n * (itemsize + jnp.dtype(out_dtype).itemsize),
    )

    out2d = pl.pallas_call(
        _affine_kernel,
        out_shape=jax.ShapeDtypeStruct((rows, lane_w), out_dtype),
        grid=grid,
        in_specs=[
            pl.BlockSpec(memory_space=pltpu.MemorySpace.SMEM),     # [scale, bias]
            pl.BlockSpec((block_rows, lane_w), lambda i: (i, 0)),
        ],
        out_specs=pl.BlockSpec((block_rows, lane_w), lambda i: (i, 0)),
        compiler_params=pltpu.CompilerParams(
            dimension_semantics=("parallel",),
            vmem_limit_bytes=_VMEM_LIMIT_BYTES,
        ),
        cost_estimate=cost,
    )(sb, x2d)

    return out2d.reshape(orig_shape)


def embedding_preprocessing(x, mean, std):
    """Pallas equivalent of EmbeddingPreprocessing.forward: (x - mean) / std."""
    mean = jnp.asarray(mean, jnp.float32)
    std = jnp.asarray(std, jnp.float32)
    scale = 1.0 / std                 # hoisted exact f32 divide, done once
    bias = -mean * scale              # (x - mean)/std == x*scale + bias
    return _run_affine(x, scale, bias)


def embedding_preprocessing_backward(x, mean, std):
    """Pallas equivalent of EmbeddingPreprocessing.backward: x * std + mean."""
    return _run_affine(x,
                       jnp.asarray(std, jnp.float32),
                       jnp.asarray(mean, jnp.float32))


if __name__ == "__main__":
    key = jax.random.PRNGKey(0)
    # NCHW input, small shapes: batch=2, channels=4, spatial=16x16
    x = jax.random.normal(key, (2, 4, 16, 16), dtype=jnp.float32)

    # Module __init__ defaults are mean=0, std=1; exercise set() semantics
    # with non-trivial values.
    mean = 0.5
    std = 2.0

    y = embedding_preprocessing(x, mean, std)
    y = jax.block_until_ready(y)

    # Reference check in plain JAX.
    y_ref = (x - mean) / std
    assert y.shape == x.shape and y.dtype == x.dtype
    assert jnp.allclose(y, y_ref, atol=1e-6, rtol=1e-6)

    # Sanity-check the backward (inverse) path.
    x_rec = jax.block_until_ready(embedding_preprocessing_backward(y, mean, std))
    assert jnp.allclose(x_rec, x, atol=1e-5, rtol=1e-5)

    print("KERNEL_OK")
</pallas_src>

<mosaic_0001>
module attributes {stable_mosaic.version = 11 : i64} {
  func.func @_affine_kernel(%arg0: i32, %arg1: memref<2xf32, #tpu.memory_space<smem>>, %arg2: memref<1x2048xf32, #tpu.memory_space<vmem>>, %arg3: memref<1x2048xf32, #tpu.memory_space<vmem>>) attributes {dimension_semantics = [#tpu.dimension_semantics<parallel>], iteration_bounds = array<i64: 1>, scalar_prefetch = 0 : i64, scratch_operands = 0 : i64, tpu.core_type = #tpu.core_type<tc>, window_params = [{transform_indices = @transform_0, window_bounds = array<i64: 2>}, {transform_indices = @transform_1, window_bounds = array<i64: 1, 2048>}, {transform_indices = @transform_2, window_bounds = array<i64: 1, 2048>}]} {
    %c0 = arith.constant 0 : index
    %c0_0 = arith.constant 0 : index
    %0 = vector.load %arg2[%c0, %c0_0] : memref<1x2048xf32, #tpu.memory_space<vmem>>, vector<1x2048xf32>
    %c0_1 = arith.constant 0 : index
    %1 = memref.load %arg1[%c0_1] : memref<2xf32, #tpu.memory_space<smem>>
    %2 = vector.broadcast %1 : f32 to vector<1x2048xf32>
    %3 = arith.mulf %0, %2 : vector<1x2048xf32>
    %c1 = arith.constant 1 : index
    %4 = memref.load %arg1[%c1] : memref<2xf32, #tpu.memory_space<smem>>
    %5 = vector.broadcast %4 : f32 to vector<1x2048xf32>
    %6 = arith.addf %3, %5 : vector<1x2048xf32>
    %c0_2 = arith.constant 0 : index
    %c0_3 = arith.constant 0 : index
    %7 = vector.load %arg3[%c0_2, %c0_3] : memref<1x2048xf32, #tpu.memory_space<vmem>>, vector<1x2048xf32>
    tpu.vector_store %arg3[%c0_2, %c0_3], %6 {strides = array<i32>} : memref<1x2048xf32, #tpu.memory_space<vmem>>, vector<1x2048xf32>,
    return
  }
  func.func @transform_0(%arg0: i32) -> i32 {
    %c0_i32 = arith.constant 0 : i32
    %c0_i32_0 = arith.constant 0 : i32
    return %c0_i32 : i32
  }
  func.func @transform_1(%arg0: i32) -> (i32, i32) {
    %c0_i32 = arith.constant 0 : i32
    %c0_i32_0 = arith.constant 0 : i32
    return %arg0, %c0_i32 : i32, i32
  }
  func.func @transform_2(%arg0: i32) -> (i32, i32) {
    %c0_i32 = arith.constant 0 : i32
    %c0_i32_0 = arith.constant 0 : i32
    return %arg0, %c0_i32 : i32, i32
  }
}

</mosaic_0001>

<bundles_post_ra>
// kernel: tpu_custom_call.1
= control target key start
LH: loop header
LB: loop body
LE: loop exit
PB: predicated region body
PF: predicated region fallthrough
CT: control target
= control target key end

     0   :  { %7 = vsyncpa [#allocation5], 0  ;;  %s181_s0 = inlined_call_operand.hbm [shape: f32[2], index: 0, kind: input, shape index: {}]   ;;  %s182_s1 = inlined_call_operand.hbm [shape: f32[1,2048], index: 1, kind: input, shape index: {}]   ;;  %s183_s2 = inlined_call_operand.hbm [shape: f32[1,2048], index: 2, kind: output, shape index: {}]  }
   0x1   :  { %8 = vsyncpa [#allocation3], 0 }
   0x2   :  { %9 = vsyncpa [#allocation4], 0  ;;  %s67_s11 = scalar_lea.hbm %s181_s0, 16 }
   0x3   :  { %p68_p0 = scmp.ne.s32.totalorder %s181_s0, %s67_s11  ;;  %p71_p1 = scmp.lt.u32.totalorder %s67_s11, %s181_s0 }
   0x5   :  { %p73_p2 = pnand %p71_p1, %p68_p0 }
   0x7   :  { %76 = shalt.err (!%p73_p2)
}
   0x8   :  { %s127_s16 = smov [#allocation2]   ;;  %s128_s19 = smov [#allocation6]  }
   0x9   :  { %17 = dma.hbm_to_smem %s181_s0, 16, %s127_s16, [#allocation5]  }
   0xa   :  { %s24_s20 = sshll.u32 %s128_s19, 4  ;;  %s77_s23 = scalar_lea.hbm %s182_s1, 256  ;;  %s25_s20 = int_to_ptr.vmem [resolvable:$true] %s24_s20 }
   0xb   :  { %p78_p3 = scmp.ne.s32.totalorder %s182_s1, %s77_s23  ;;  %p81_p4 = scmp.lt.u32.totalorder %s77_s23, %s182_s1 }
   0xd   :  { %p83_p5 = pnand %p81_p4, %p78_p3 }
   0xf   :  { %86 = shalt.err (!%p83_p5)
}
  0x10   :  { %s87_s28 = scalar_lea.vmem %s25_s20, 256  ;;  %p92_p7 = scmp.lt.s32.totalorder %s25_s20, %s25_s20 }
  0x11   :  { %p88_p6 = scmp.ne.s32.totalorder %s25_s20, %s87_s28  ;;  %p93_p8 = scmp.lt.s32.totalorder %s87_s28, %s87_s28 }
  0x13   :  { %p94_p9 = por %p93_p8, %p92_p7 }
  0x15   :  { %p95_p10 = pnand %p94_p9, %p88_p6 }
  0x17   :  { %98 = shalt.err (!%p95_p10)
}
  0x18   :  { %27 = dma.hbm_to_vmem [thread:$0]  %s182_s1, 256, %s25_s20, [#allocation3]  }
  0x19   :  { %121 = dma.done.wait [#allocation5], 16  }
  0x1a   :  { %122 = vsyncadd [#allocation5], 4294967280 }
  0x1b   :  { %123 = dma.done.wait [#allocation3], 256  }
  0x1c   :  { %124 = vsyncadd [#allocation3], 4294967040 }
  0x1d   :  { %34 = sfence }
  0x1e   :  { %s37_s30 = sld [smem:[#allocation2]]  ;;  %s63_s3 = sld [smem:[#allocation2 + $0x1]]  ;;  %v35_v0 = vld [vmem:[#allocation6] sm:$0xff]  ;;  %v36_v1 = vld [vmem:[#allocation6 + $0x8] sm:$0xff] }
  0x1f   :  { %s129_s4 = smov [#allocation7]  }
  0x20   :  { %s53_s5 = sshll.u32 %s129_s4, 4  ;;  %s54_s5 = int_to_ptr.vmem [resolvable:$true] %s53_s5 }
  0x21   :  { %s99_s1 = scalar_lea.vmem %s54_s5, 256  ;;  %p104_p12 = scmp.lt.s32.totalorder %s54_s5, %s54_s5 }
  0x22   :  { %p100_p11 = scmp.ne.s32.totalorder %s54_s5, %s99_s1  ;;  %p105_p13 = scmp.lt.s32.totalorder %s99_s1, %s99_s1 }
  0x24   :  { %v38_v2 = vstv %s37_s30  ;;  %v42_v3 = vstv %s63_s3  ;;  %p106_p0 = por %p105_p13, %p104_p12 }
  0x25   :  { %v39_v4 = vmul.f32 %v38_v2, %v35_v0  ;;  %v40_v5 = vmul.f32 %v38_v2, %v36_v1 }
  0x26   :  { %p107_p1 = pnand %p106_p0, %p100_p11 }
  0x27   :  { %v43_v6 = vadd.f32 %v42_v3, %v39_v4  ;;  %v44_v7 = vadd.f32 %v42_v3, %v40_v5 }
  0x29   :  { %45 = vst [vmem:[#allocation7] sm:$0xff] %v43_v6  ;;  %46 = vst [vmem:[#allocation7 + $0x8] sm:$0xff] %v44_v7 }
  0x2a   :  { %110 = shalt.err (!%p107_p1)
}
  0x2b   :  { %s111_s8 = scalar_lea.hbm %s183_s2, 256 }
  0x2c   :  { %p112_p2 = scmp.ne.s32.totalorder %s183_s2, %s111_s8  ;;  %p115_p3 = scmp.lt.u32.totalorder %s111_s8, %s183_s2 }
  0x2e   :  { %p117_p4 = pnand %p115_p3, %p112_p2 }
  0x30   :  { %120 = shalt.err (!%p117_p4)
}
  0x31   :  { %56 = dma.vmem_to_hbm [thread:$0]  %s54_s5, 256, %s183_s2, [#allocation4]  }
  0x32   :  { %125 = dma.done.wait [#allocation4], 256  }
  0x33   :  { %126 = vsyncadd [#allocation4], 4294967040 }
  0x34   :  { %60 = vsyncpa [#allocation3], 1 }
  0x35   :  { %61 = vsyncpa [#allocation4], 1 }
  0x36   :  { %62 = vsyncpa [#allocation5], 1 }

</bundles_post_ra>
